<compile_context>
chip_gen: v7x
topology: tpu7x:2x2x1
jax: 0.10.0
libtpu: 0.0.40
codegen_flags: <defaults>
</compile_context>

<pallas_src>
import math

import jax
import jax.numpy as jnp
from jax.experimental import pallas as pl
from jax.experimental.pallas import tpu as pltpu


_NEG_FILL = -1e30  # padding fill for logits; exp(_NEG_FILL) == 0 in f32


def _round_up(x: int, n: int) -> int:
    return ((x + n - 1) // n) * n


def _make_amsl_kernel(exp_m: float, eps: float, tc: int):
    """Kernel over one (TB, TC) logits tile; accumulates across class tiles."""
    assert tc % 128 == 0
    n_lane_groups = tc // 128

    def kernel(logits_ref, labels_ref, numer_ref, lrow_ref, denom_acc):
        c = pl.program_id(1)
        nc = pl.num_programs(1)

        @pl.when(c == 0)
        def _():
            denom_acc[...] = jnp.zeros_like(denom_acc)

        logits = logits_ref[...].astype(jnp.float32)          # (TB, TC) f32

        # Label mask: offset lives on the (TB, 1) label side, not on a full
        # (TB, TC) iota add.  Padded / out-of-tile labels never match.
        lbl_local = labels_ref[...] - c * tc                   # (TB, 1) int32
        col = jax.lax.broadcasted_iota(jnp.int32, logits.shape, 1)
        e = jnp.where(col == lbl_local, 0.0, jnp.exp(logits))  # exp(m) factored out

        # Lane-wide accumulation: pure VALU adds into a (TB, 128) accumulator;
        # the cross-lane (XLU) reduce happens only once, at finalize.
        acc = denom_acc[...]
        for k in range(n_lane_groups):
            acc = acc + e[:, k * 128:(k + 1) * 128]
        denom_acc[...] = acc

        @pl.when(c == nc - 1)
        def _():
            numer = numer_ref[...]                              # (TB, 1) f32
            total = jnp.sum(denom_acc[...], axis=1, keepdims=True)
            # sum_{j!=y} exp(l_j + m) + exp(n)   (cancellation-free form,
            # algebraically identical to the PyTorch expression).
            denom = total * exp_m + jnp.exp(numer)
            lrow_ref[...] = numer - jnp.log(denom + eps)

    return kernel


def ams_loss(logits: jax.Array, labels: jax.Array, m: float = 1.0,
             eps: float = 1e-10, block_b: int = 512,
             block_c: int = 4096) -> jax.Array:
    """Pallas implementation of AMSLoss.forward. logits: (B, C), labels: (B,)."""
    B, C = logits.shape
    labels_i32 = labels.astype(jnp.int32)

    # Numerator (label logit) gathered once in the wrapper: B elements, tiny.
    numer = jnp.take_along_axis(
        logits.astype(jnp.float32), labels_i32[:, None], axis=1)  # (B, 1) f32

    # Sub-32-bit dtypes pack 16 rows per sublane group.
    sub = 16 if logits.dtype in (jnp.bfloat16, jnp.float16) else 8

    # Class tile: lane-multiple, as large as the (padded) problem allows.
    TC = min(block_c, _round_up(C, 128))
    # Batch tile: adaptive so that there are >= 2 parallel batch tiles whenever
    # the batch is large enough (megacore sharding on v7x).
    B_sub = _round_up(B, sub)
    TB = min(block_b, max(sub, _round_up(pl.cdiv(B_sub, 2), sub)))

    B_pad = _round_up(B, TB)
    C_pad = _round_up(C, TC)

    if (B_pad, C_pad) != (B, C):
        logits = jnp.pad(logits, ((0, B_pad - B), (0, C_pad - C)),
                         constant_values=_NEG_FILL)
    labels2d = labels_i32.reshape(B, 1)
    if B_pad != B:
        labels2d = jnp.pad(labels2d, ((0, B_pad - B), (0, 0)))
        numer = jnp.pad(numer, ((0, B_pad - B), (0, 0)))

    grid = (B_pad // TB, C_pad // TC)

    per_row = pl.pallas_call(
        _make_amsl_kernel(math.exp(m), float(eps), TC),
        out_shape=jax.ShapeDtypeStruct((B_pad, 1), jnp.float32),
        grid=grid,
        in_specs=[
            # Logits stream in their native dtype; cast to f32 in-kernel.
            pl.BlockSpec((TB, TC), lambda b, c: (b, c)),
            # Labels: tiny (TB, 1) int32 block, resident per batch tile.
            pl.BlockSpec((TB, 1), lambda b, c: (b, 0)),
            # Wrapper-gathered numerator: tiny (TB, 1) f32, resident per tile.
            pl.BlockSpec((TB, 1), lambda b, c: (b, 0)),
        ],
        # Per-row L, written once per batch tile at the last class tile.
        out_specs=pl.BlockSpec((TB, 1), lambda b, c: (b, 0)),
        scratch_shapes=[
            pltpu.VMEM((TB, 128), jnp.float32),   # lane-wide denominator acc
        ],
        compiler_params=pltpu.CompilerParams(
            dimension_semantics=("parallel", "arbitrary"),
            # TB=512, TC=4096 f32 double-buffered is ~16 MiB; safe on v7x's
            # 64 MiB physical VMEM as well as v5e/v6e.
            vmem_limit_bytes=32 * 1024 * 1024,
        ),
    )(logits, labels2d, numer)

    # Final mean over the true (unpadded) batch, negated — tiny, in plain JAX.
    return -jnp.sum(per_row[:B, 0]) / B


def ams_loss_ref(logits, labels, m=1.0, eps=1e-10):
    """Pure-JAX reference mirroring the PyTorch module."""
    logits = logits.astype(jnp.float32)
    one_minus_exp_m = 1.0 - math.exp(m)
    numerator = jnp.take_along_axis(logits, labels[:, None], axis=1)[:, 0]
    denominator = jnp.sum(jnp.exp(logits + m), axis=1) \
        + jnp.exp(numerator) * one_minus_exp_m
    L = numerator - jnp.log(denominator + eps)
    return -jnp.mean(L)


if __name__ == "__main__":
    key = jax.random.PRNGKey(0)
    k_logits, k_labels, k_logits2, k_labels2 = jax.random.split(key, 4)

    # Test 1: small shapes, deliberately NOT multiples of (8, 128), f32.
    B, C = 6, 20
    logits = jax.random.normal(k_logits, (B, C), dtype=jnp.float32)
    labels = jax.random.randint(k_labels, (B,), 0, C, dtype=jnp.int32)
    loss = jax.block_until_ready(ams_loss(logits, labels, m=1.0))
    ref = ams_loss_ref(logits, labels, m=1.0)
    assert jnp.allclose(loss, ref, atol=1e-5, rtol=1e-5), (loss, ref)

    # Test 2: bf16 logits, multiple class tiles and >1 batch tile
    # (exercises the 16-row sublane rounding and cross-tile accumulation).
    B2, C2 = 48, 300
    logits2 = jax.random.normal(k_logits2, (B2, C2), dtype=jnp.bfloat16)
    labels2 = jax.random.randint(k_labels2, (B2,), 0, C2, dtype=jnp.int32)
    loss2 = jax.block_until_ready(
        ams_loss(logits2, labels2, m=1.0, block_c=128))
    ref2 = ams_loss_ref(logits2, labels2, m=1.0)
    assert jnp.allclose(loss2, ref2, atol=1e-4, rtol=1e-4), (loss2, ref2)

    print("KERNEL_OK")
</pallas_src>

<mosaic_0001>
module attributes {stable_mosaic.version = 11 : i64} {
  func.func @kernel(%arg0: i32, %arg1: i32, %arg2: memref<8x128xf32, #tpu.memory_space<vmem>>, %arg3: memref<8x1xi32, #tpu.memory_space<vmem>>, %arg4: memref<8x1xf32, #tpu.memory_space<vmem>>, %arg5: memref<8x1xf32, #tpu.memory_space<vmem>>, %arg6: memref<8x128xf32, #tpu.memory_space<vmem>>) attributes {dimension_semantics = [#tpu.dimension_semantics<parallel>, #tpu.dimension_semantics<arbitrary>], iteration_bounds = array<i64: 1, 1>, scalar_prefetch = 0 : i64, scratch_operands = 1 : i64, tpu.core_type = #tpu.core_type<tc>, window_params = [{transform_indices = @transform_0, window_bounds = array<i64: 8, 128>}, {transform_indices = @transform_1, window_bounds = array<i64: 8, 1>}, {transform_indices = @transform_2, window_bounds = array<i64: 8, 1>}, {transform_indices = @transform_3, window_bounds = array<i64: 8, 1>}]} {
    %c0_i32 = arith.constant 0 : i32
    %0 = arith.cmpi eq, %arg1, %c0_i32 : i32
    %1 = arith.extui %0 : i1 to i32
    %c0_i32_0 = arith.constant 0 : i32
    %2 = arith.cmpi ne, %1, %c0_i32_0 : i32
    scf.if %2 {
      %cst_10 = arith.constant 0.000000e+00 : f32
      %20 = vector.broadcast %cst_10 : f32 to vector<8x128xf32>
      %c0_11 = arith.constant 0 : index
      %c0_12 = arith.constant 0 : index
      %21 = vector.load %arg6[%c0_11, %c0_12] : memref<8x128xf32, #tpu.memory_space<vmem>>, vector<8x128xf32>
      tpu.vector_store %arg6[%c0_11, %c0_12], %20 {strides = array<i32>} : memref<8x128xf32, #tpu.memory_space<vmem>>, vector<8x128xf32>,
    } else {
    }
    %c0 = arith.constant 0 : index
    %c0_1 = arith.constant 0 : index
    %3 = vector.load %arg2[%c0, %c0_1] : memref<8x128xf32, #tpu.memory_space<vmem>>, vector<8x128xf32>
    %c0_2 = arith.constant 0 : index
    %c0_3 = arith.constant 0 : index
    %4 = vector.load %arg3[%c0_2, %c0_3] : memref<8x1xi32, #tpu.memory_space<vmem>>, vector<8x1xi32>
    %c128_i32 = arith.constant 128 : i32
    %5 = arith.muli %arg1, %c128_i32 : i32
    %6 = vector.broadcast %5 : i32 to vector<8x1xi32>
    %7 = arith.subi %4, %6 : vector<8x1xi32>
    %8 = tpu.iota {dimensions = array<i32: 1>} : vector<8x128xi32>
    %9 = vector.broadcast %7 : vector<8x1xi32> to vector<8x128xi32>
    %10 = arith.cmpi eq, %8, %9 : vector<8x128xi32>
    %11 = math.exp %3 : vector<8x128xf32>
    %cst = arith.constant 0.000000e+00 : f32
    %12 = vector.broadcast %cst : f32 to vector<8x128xf32>
    %13 = arith.select %10, %12, %11 : vector<8x128xi1>, vector<8x128xf32>
    %c0_4 = arith.constant 0 : index
    %c0_5 = arith.constant 0 : index
    %14 = vector.load %arg6[%c0_4, %c0_5] : memref<8x128xf32, #tpu.memory_space<vmem>>, vector<8x128xf32>
    %15 = arith.addf %14, %13 : vector<8x128xf32>
    %c0_6 = arith.constant 0 : index
    %c0_7 = arith.constant 0 : index
    %16 = vector.load %arg6[%c0_6, %c0_7] : memref<8x128xf32, #tpu.memory_space<vmem>>, vector<8x128xf32>
    tpu.vector_store %arg6[%c0_6, %c0_7], %15 {strides = array<i32>} : memref<8x128xf32, #tpu.memory_space<vmem>>, vector<8x128xf32>,
    %c0_i32_8 = arith.constant 0 : i32
    %17 = arith.cmpi eq, %arg1, %c0_i32_8 : i32
    %18 = arith.extui %17 : i1 to i32
    %c0_i32_9 = arith.constant 0 : i32
    %19 = arith.cmpi ne, %18, %c0_i32_9 : i32
    scf.if %19 {
      %c0_10 = arith.constant 0 : index
      %c0_11 = arith.constant 0 : index
      %20 = vector.load %arg4[%c0_10, %c0_11] : memref<8x1xf32, #tpu.memory_space<vmem>>, vector<8x1xf32>
      %c0_12 = arith.constant 0 : index
      %c0_13 = arith.constant 0 : index
      %21 = vector.load %arg6[%c0_12, %c0_13] : memref<8x128xf32, #tpu.memory_space<vmem>>, vector<8x128xf32>
      %cst_14 = arith.constant dense<0.000000e+00> : vector<8xf32>
      %22 = vector.multi_reduction <add>, %21, %cst_14 [1] : vector<8x128xf32> to vector<8xf32>
      %23 = vector.shape_cast %22 : vector<8xf32> to vector<8x1xf32>
      %cst_15 = arith.constant 2.71828175 : f32
      %24 = vector.broadcast %cst_15 : f32 to vector<8x1xf32>
      %25 = arith.mulf %23, %24 : vector<8x1xf32>
      %26 = math.exp %20 : vector<8x1xf32>
      %27 = arith.addf %25, %26 : vector<8x1xf32>
      %cst_16 = arith.constant 1.000000e-10 : f32
      %28 = vector.broadcast %cst_16 : f32 to vector<8x1xf32>
      %29 = arith.addf %27, %28 : vector<8x1xf32>
      %30 = math.log %29 : vector<8x1xf32>
      %31 = arith.subf %20, %30 : vector<8x1xf32>
      %c0_17 = arith.constant 0 : index
      %c0_18 = arith.constant 0 : index
      %32 = vector.load %arg5[%c0_17, %c0_18] : memref<8x1xf32, #tpu.memory_space<vmem>>, vector<8x1xf32>
      tpu.vector_store %arg5[%c0_17, %c0_18], %31 {strides = array<i32>} : memref<8x1xf32, #tpu.memory_space<vmem>>, vector<8x1xf32>,
    } else {
    }
    return
  }
  func.func @transform_0(%arg0: i32, %arg1: i32) -> (i32, i32) {
    %c0_i32 = arith.constant 0 : i32
    return %arg0, %arg1 : i32, i32
  }
  func.func @transform_1(%arg0: i32, %arg1: i32) -> (i32, i32) {
    %c0_i32 = arith.constant 0 : i32
    %c0_i32_0 = arith.constant 0 : i32
    return %arg0, %c0_i32 : i32, i32
  }
  func.func @transform_2(%arg0: i32, %arg1: i32) -> (i32, i32) {
    %c0_i32 = arith.constant 0 : i32
    %c0_i32_0 = arith.constant 0 : i32
    return %arg0, %c0_i32 : i32, i32
  }
  func.func @transform_3(%arg0: i32, %arg1: i32) -> (i32, i32) {
    %c0_i32 = arith.constant 0 : i32
    %c0_i32_0 = arith.constant 0 : i32
    return %arg0, %c0_i32 : i32, i32
  }
}

</mosaic_0001>

<bundles_post_ra>
// kernel: tpu_custom_call.1
= control target key start
LH: loop header
LB: loop body
LE: loop exit
PB: predicated region body
PF: predicated region fallthrough
CT: control target
= control target key end

     0   :  { %v65_v0 = vmov 0   ;;  %v24_v4 = vlaneseq  ;;  %vm51_vm1 = vcmask 7168   ;;  %s98_s1 = inlined_call_operand.vmem [shape: s32[8,1], index: 1, kind: input, shape index: {}]   ;;  %s99_s0 = inlined_call_operand.vmem [shape: f32[8,128], index: 0, kind: input, shape index: {}]   ;;  %s100_s2 = inlined_call_operand.vmem [shape: f32[8,1], index: 2, kind: input, shape index: {}]   ;;  %s101_s3 = inlined_call_operand.vmem [shape: f32[8,1], index: 3, kind: output, shape index: {}]  }
   0x1   :  { %58 = vset.pattern.permute.xlu0 %v65_v0  ;;  %v20_v1 = vld [vmem:[%s98_s1] sm:$0xff] }
   0x2   :  { %27 = vperm.xlu0 %58, %v20_v1   ;;  %v19_v2 = vld [vmem:[%s99_s0] sm:$0xff]  ;;  %v25_v5 = vand.u32 127, %v24_v4 }
   0x3   :  { %v30_v3 = vmul.f32 1.442695, %v19_v2  ;;  %v39_v9 = vld [vmem:[%s100_s2] sm:$0xff] }
   0x4   :  { %v44_v10 = vmul.f32 1.442695, %v39_v9 }
   0x5   :  { %59 = vpow2.f32 %v30_v3 }
   0x6   :  { %61 = vpow2.f32 %v44_v10 }
   0xf   :  { %v60_v6 = vpop.eup %59 }
  0x10   :  { %v62_v11 = vpop.eup %61 }
  0x81   :  { %v28_v7 = vpop.permute.xlu0 %27 }
  0x82   :  { %vm29_vm0 = vcmp.eq.s32.totalorder %v25_v5, %v28_v7 }
  0x83   :  { %v32_v8 = vsel %vm29_vm0, 0.0, %v60_v6 }
  0x84   :  { %41 = vadd.xlane.f32.xlu0 %v32_v8 }
 0x111   :  { %v42_v12 = vpop.xlane.xlu0 %41 }
 0x112   :  { %v43_v13 = vmul.f32 2.7182817, %v42_v12 }
 0x114   :  { %v46_v14 = vadd.f32 %v62_v11, %v43_v13 }
 0x116   :  { %v47_v15 = vadd.f32 1e-10, %v46_v14 }
 0x118   :  { %63 = vlog2.f32 %v47_v15 }
 0x122   :  { %v64_v16 = vpop.eup %63 }
 0x123   :  { %v49_v17 = vmul.f32 0.6931472, %v64_v16 }
 0x125   :  { %v50_v18 = vsub.f32 %v39_v9, %v49_v17 }
 0x127   :  { %52 = vst.msk [vmem:[%s101_s3] sm:$0xff] %vm51_vm1, %v50_v18 }

</bundles_post_ra>
